<compile_context>
chip_gen: v7x
topology: tpu7x:2x2x1
jax: 0.10.0
libtpu: 0.0.40
codegen_flags: <defaults>
</compile_context>

<pallas_src>
import functools

import numpy as np

import jax
import jax.numpy as jnp
from jax.experimental import pallas as pl
from jax.experimental.pallas import tpu as pltpu


# --------------------------------------------------------------------------
# Host-side helpers
# --------------------------------------------------------------------------
def _fit_sin_turns_coeffs(n_terms=8, n_samples=1024):
    """Odd-polynomial least-squares fit of sin(2*pi*r) for r in [-0.5, 0.5].

    The fit is done in the scaled variable v = 2*r (well conditioned), then
    rescaled by exact powers of two so the kernel evaluates directly in r via
    Horner on u = r*r.  Max error is ~1e-7, far below f32 roundoff of the
    angle itself.
    """
    theta = (np.arange(n_samples, dtype=np.float64) + 0.5) * (np.pi / n_samples)
    v = 0.5 * (1.0 - np.cos(theta))                       # Chebyshev-spaced in [0, 1]
    a = np.stack([v ** (2 * m + 1) for m in range(n_terms)], axis=1)
    y = np.sin(np.pi * v)                                 # sin(2*pi*r), v = 2*r
    cv, *_ = np.linalg.lstsq(a, y, rcond=None)
    return tuple(float(cv[m] * (2.0 ** (2 * m + 1))) for m in range(n_terms))


_SIN_COEFFS = _fit_sin_turns_coeffs()


def _num_tensorcores():
    """Best-effort TensorCore count per chip (v7x=2); falls back to 1."""
    try:
        info = pltpu.get_tpu_info()
    except Exception:
        return 1
    for name in ("num_cores", "core_count", "tensorcore_count", "num_tensor_cores"):
        v = getattr(info, name, None)
        if isinstance(v, int) and v > 0:
            return v
    return 1


def _choose_tiling(total_p, out_c, itemsize, *, target_bytes=(4 << 20), cores=1):
    """Pick (block_p, padded_p, steps): lane tile, padded extent, grid steps.

    block_p is a multiple of 128 targeting ~4 MiB per output tile (2x
    double-buffered tiles stay under v5e's 16 MiB default scoped VMEM).  The
    flattened spatial extent is padded up to steps*block_p; padding is sliced
    off in the wrapper.  On multi-TensorCore chips the step count is rounded
    to a multiple of the core count so megacore sharding is even.
    """
    groups = -(-total_p // 128)                                  # 128-lane groups needed
    tile_groups_target = max(1, (target_bytes // (out_c * itemsize)) // 128)
    steps = max(1, -(-groups // tile_groups_target))
    if cores > 1 and groups >= cores and steps % cores != 0:
        steps = -(-steps // cores) * cores
    bp_groups = -(-groups // steps)
    block_p = bp_groups * 128
    padded_p = steps * block_p
    return block_p, padded_p, steps


# --------------------------------------------------------------------------
# Kernel
# --------------------------------------------------------------------------
def _pe_kernel(base_ref, coef_ref, out_ref, *, w, block_p, sin_coeffs):
    """One (2F, block_p) tile of the positional encoding.

    base_ref: (steps, 2) int32 SMEM, exact [base_row, base_col] per grid step.
    coef_ref: (2F, 3) f32 VMEM, per-channel [ax, ay, c0] (angle in turns).
    out_ref:  (2F, block_p) output tile, lanes = flattened spatial index.
    """
    pid = pl.program_id(0)
    base_row = base_ref[pid, 0].astype(jnp.float32)
    base_col = base_ref[pid, 1].astype(jnp.float32)

    # In-tile lane offset; base_col + lane < w + block_p, small enough that the
    # f32 floor/reciprocal below is exact (margin 0.5/w >> rounding error).
    lane = jax.lax.broadcasted_iota(jnp.int32, (1, block_p), 1).astype(jnp.float32)
    q = lane + base_col
    row_off = jnp.floor((q + 0.5) * (1.0 / float(w)))
    j_col = q - row_off * float(w)
    i_row = base_row + row_off

    coef = coef_ref[...]                      # (2F, 3), tiny, once per step
    ax = coef[:, 0:1]                         # (2F, 1) broadcast over lanes
    ay = coef[:, 1:2]
    c0 = coef[:, 2:3]

    # Angle in turns; range-reduce to [-0.5, 0.5] and evaluate sin(2*pi*r)
    # with a short odd polynomial (Horner in u = r*r) instead of jnp.sin.
    t = j_col * ax + i_row * ay + c0          # (2F, block_p)
    r = t - jnp.floor(t + 0.5)
    u = r * r
    s = jnp.float32(sin_coeffs[-1])
    for c in sin_coeffs[-2::-1]:
        s = s * u + jnp.float32(c)
    out_ref[...] = (r * s).astype(out_ref.dtype)


# --------------------------------------------------------------------------
# Wrapper
# --------------------------------------------------------------------------
def position_embedding_random(size, gaussian_matrix, *, out_dtype=jnp.float32):
    """Pallas equivalent of PositionEmbeddingRandom.forward(size).

    Args:
      size: (h, w) spatial grid size.
      gaussian_matrix: (2, num_pos_feats) float32 frequency matrix.
      out_dtype: output dtype (float32 matches PyTorch; bfloat16 halves HBM
        write traffic on the write-bandwidth-bound v5e/v6e if the consumer
        tolerates it).  All math is done in f32; cast happens at the store.
    Returns:
      (2 * num_pos_feats, h, w) positional encoding.
    """
    h, w = int(size[0]), int(size[1])
    g = jnp.asarray(gaussian_matrix, jnp.float32)
    num_pos_feats = int(g.shape[1])
    out_c = 2 * num_pos_feats          # note: best if 2F is sublane aligned (mult of 8/16)
    total_p = h * w

    # Fold the (2*x - 1) affine, the 1/(2*pi) turns scale, and the cos phase
    # shift into per-channel coefficients:  t[c, p] = j*ax[c] + i*ay[c] + c0[c]
    #   ax = 2*G[0, c mod F] / w
    #   ay = 2*G[1, c mod F] / h
    #   c0 = G[0]*(1/w - 1) + G[1]*(1/h - 1) + (0 | 0.25)   [turns]
    g2 = jnp.concatenate([g, g], axis=1)                         # (2, 2F)
    ax = (2.0 / w) * g2[0]
    ay = (2.0 / h) * g2[1]
    phase = jnp.concatenate(
        [jnp.zeros((num_pos_feats,), jnp.float32),
         jnp.full((num_pos_feats,), 0.25, jnp.float32)])
    c0 = g2[0] * (1.0 / w - 1.0) + g2[1] * (1.0 / h - 1.0) + phase
    coef = jnp.stack([ax, ay, c0], axis=1)                       # (2F, 3)

    itemsize = jnp.dtype(out_dtype).itemsize
    block_p, padded_p, steps = _choose_tiling(
        total_p, out_c, itemsize, cores=_num_tensorcores())

    # Exact per-grid-step base (row, col) of the flattened index, int math on
    # the host -> no f32 divide/floor precision hazard for large grids.
    base_tbl = jnp.asarray(
        [[(s * block_p) // w, (s * block_p) % w] for s in range(steps)],
        dtype=jnp.int32)                                         # (steps, 2)

    tile_bytes = out_c * block_p * itemsize
    kernel = functools.partial(_pe_kernel, w=w, block_p=block_p,
                               sin_coeffs=_SIN_COEFFS)

    pe_flat = pl.pallas_call(
        kernel,
        out_shape=jax.ShapeDtypeStruct((out_c, padded_p), out_dtype),
        grid_spec=pltpu.PrefetchScalarGridSpec(
            num_scalar_prefetch=1,
            grid=(steps,),
            in_specs=[pl.BlockSpec((out_c, 3), lambda i, base: (0, 0))],
            out_specs=pl.BlockSpec((out_c, block_p), lambda i, base: (0, i)),
        ),
        compiler_params=pltpu.CompilerParams(
            dimension_semantics=("parallel",),
            vmem_limit_bytes=int(2 * tile_bytes + (8 << 20)),
        ),
    )(base_tbl, coef)

    if padded_p != total_p:
        pe_flat = pe_flat[:, :total_p]
    # Row-major reshape (free when unpadded): (2F, H*W) -> (2F, H, W).
    return pe_flat.reshape(out_c, h, w)


# --------------------------------------------------------------------------
# Pure-JAX reference (mirrors the PyTorch code) and self-test
# --------------------------------------------------------------------------
def _reference(size, gaussian_matrix):
    h, w = size
    grid = jnp.ones((h, w), jnp.float32)
    y_embed = (jnp.cumsum(grid, axis=0) - 0.5) / h
    x_embed = (jnp.cumsum(grid, axis=1) - 0.5) / w
    coords = jnp.stack([x_embed, y_embed], axis=-1)
    coords = 2.0 * coords - 1.0
    coords = coords @ gaussian_matrix
    coords = 2.0 * jnp.pi * coords
    pe = jnp.concatenate([jnp.sin(coords), jnp.cos(coords)], axis=-1)
    return jnp.transpose(pe, (2, 0, 1))


if __name__ == "__main__":
    num_pos_feats = 64
    scale = 1.0  # scale=None / <=0 -> 1.0 in the PyTorch module
    key = jax.random.PRNGKey(0)
    # deterministic stand-in for scale * torch.randn((2, num_pos_feats))
    gaussian_matrix = scale * jax.random.normal(
        key, (2, num_pos_feats), dtype=jnp.float32)

    # Lane-aligned case + a ragged case (exercises the padding/slice path).
    for (h, w) in [(16, 16), (12, 10)]:
        pe = position_embedding_random((h, w), gaussian_matrix)
        pe = jax.block_until_ready(pe)
        assert pe.shape == (2 * num_pos_feats, h, w), pe.shape
        ref = _reference((h, w), gaussian_matrix)
        assert jnp.allclose(pe, ref, atol=1e-4, rtol=1e-5), \
            f"mismatch vs reference at size {(h, w)}"

    # bfloat16 output path (halves HBM write traffic on v5e/v6e).
    pe_bf16 = position_embedding_random((16, 16), gaussian_matrix,
                                        out_dtype=jnp.bfloat16)
    pe_bf16 = jax.block_until_ready(pe_bf16)
    ref = _reference((16, 16), gaussian_matrix)
    assert pe_bf16.dtype == jnp.bfloat16
    assert jnp.allclose(pe_bf16.astype(jnp.float32), ref, atol=1.5e-2), \
        "bf16 output mismatch vs reference"

    print("KERNEL_OK")
</pallas_src>

<mosaic_0001>
module attributes {stable_mosaic.version = 11 : i64} {
  func.func @_pe_kernel(%arg0: i32, %arg1: memref<1x2xi32, #tpu.memory_space<smem>>, %arg2: memref<128x3xf32, #tpu.memory_space<vmem>>, %arg3: memref<128x256xf32, #tpu.memory_space<vmem>>) attributes {dimension_semantics = [#tpu.dimension_semantics<parallel>], iteration_bounds = array<i64: 1>, scalar_prefetch = 1 : i64, scratch_operands = 0 : i64, tpu.core_type = #tpu.core_type<tc>, window_params = [{pipeline_mode = #tpu.pipeline_mode<synchronous>, transform_indices = @transform_0, window_bounds = array<i64: 128, 3>}, {transform_indices = @transform_1, window_bounds = array<i64: 128, 256>}]} {
    %0 = arith.index_cast %arg0 : i32 to index
    %c0 = arith.constant 0 : index
    %1 = memref.load %arg1[%0, %c0] : memref<1x2xi32, #tpu.memory_space<smem>>
    %2 = arith.sitofp %1 : i32 to f32
    %3 = arith.index_cast %arg0 : i32 to index
    %c1 = arith.constant 1 : index
    %4 = memref.load %arg1[%3, %c1] : memref<1x2xi32, #tpu.memory_space<smem>>
    %5 = arith.sitofp %4 : i32 to f32
    %6 = tpu.iota {dimensions = array<i32: 1>} : vector<1x256xi32>
    %7 = arith.sitofp %6 : vector<1x256xi32> to vector<1x256xf32>
    %8 = vector.broadcast %5 : f32 to vector<1x256xf32>
    %9 = arith.addf %7, %8 : vector<1x256xf32>
    %cst = arith.constant 5.000000e-01 : f32
    %10 = vector.broadcast %cst : f32 to vector<1x256xf32>
    %11 = arith.addf %9, %10 : vector<1x256xf32>
    %cst_0 = arith.constant 6.250000e-02 : f32
    %12 = vector.broadcast %cst_0 : f32 to vector<1x256xf32>
    %13 = arith.mulf %11, %12 : vector<1x256xf32>
    %14 = math.floor %13 : vector<1x256xf32>
    %cst_1 = arith.constant 1.600000e+01 : f32
    %15 = vector.broadcast %cst_1 : f32 to vector<1x256xf32>
    %16 = arith.mulf %14, %15 : vector<1x256xf32>
    %17 = arith.subf %9, %16 : vector<1x256xf32>
    %18 = vector.broadcast %2 : f32 to vector<1x256xf32>
    %19 = arith.addf %18, %14 : vector<1x256xf32>
    %c0_2 = arith.constant 0 : index
    %c0_3 = arith.constant 0 : index
    %20 = vector.load %arg2[%c0_2, %c0_3] : memref<128x3xf32, #tpu.memory_space<vmem>>, vector<128x3xf32>
    %21 = vector.extract_strided_slice %20 {offsets = [0, 0], sizes = [128, 1], strides = [1, 1]} : vector<128x3xf32> to vector<128x1xf32>
    %22 = vector.extract_strided_slice %20 {offsets = [0, 1], sizes = [128, 1], strides = [1, 1]} : vector<128x3xf32> to vector<128x1xf32>
    %23 = vector.extract_strided_slice %20 {offsets = [0, 2], sizes = [128, 1], strides = [1, 1]} : vector<128x3xf32> to vector<128x1xf32>
    %24 = vector.broadcast %17 : vector<1x256xf32> to vector<128x256xf32>
    %25 = vector.broadcast %21 : vector<128x1xf32> to vector<128x256xf32>
    %26 = arith.mulf %24, %25 : vector<128x256xf32>
    %27 = vector.broadcast %19 : vector<1x256xf32> to vector<128x256xf32>
    %28 = vector.broadcast %22 : vector<128x1xf32> to vector<128x256xf32>
    %29 = arith.mulf %27, %28 : vector<128x256xf32>
    %30 = arith.addf %26, %29 : vector<128x256xf32>
    %31 = vector.broadcast %23 : vector<128x1xf32> to vector<128x256xf32>
    %32 = arith.addf %30, %31 : vector<128x256xf32>
    %cst_4 = arith.constant 5.000000e-01 : f32
    %33 = vector.broadcast %cst_4 : f32 to vector<128x256xf32>
    %34 = arith.addf %32, %33 : vector<128x256xf32>
    %35 = math.floor %34 : vector<128x256xf32>
    %36 = arith.subf %32, %35 : vector<128x256xf32>
    %37 = arith.mulf %36, %36 : vector<128x256xf32>
    %cst_5 = arith.constant -0.616027414 : f32
    %38 = vector.broadcast %cst_5 : f32 to vector<128x256xf32>
    %39 = arith.mulf %38, %37 : vector<128x256xf32>
    %cst_6 = arith.constant 3.77689266 : f32
    %40 = vector.broadcast %cst_6 : f32 to vector<128x256xf32>
    %41 = arith.addf %39, %40 : vector<128x256xf32>
    %42 = arith.mulf %41, %37 : vector<128x256xf32>
    %cst_7 = arith.constant -15.084919 : f32
    %43 = vector.broadcast %cst_7 : f32 to vector<128x256xf32>
    %44 = arith.addf %42, %43 : vector<128x256xf32>
    %45 = arith.mulf %44, %37 : vector<128x256xf32>
    %cst_8 = arith.constant 42.0574417 : f32
    %46 = vector.broadcast %cst_8 : f32 to vector<128x256xf32>
    %47 = arith.addf %45, %46 : vector<128x256xf32>
    %48 = arith.mulf %47, %37 : vector<128x256xf32>
    %cst_9 = arith.constant -76.7057724 : f32
    %49 = vector.broadcast %cst_9 : f32 to vector<128x256xf32>
    %50 = arith.addf %48, %49 : vector<128x256xf32>
    %51 = arith.mulf %50, %37 : vector<128x256xf32>
    %cst_10 = arith.constant 81.6052475 : f32
    %52 = vector.broadcast %cst_10 : f32 to vector<128x256xf32>
    %53 = arith.addf %51, %52 : vector<128x256xf32>
    %54 = arith.mulf %53, %37 : vector<128x256xf32>
    %cst_11 = arith.constant -4.134170e+01 : f32
    %55 = vector.broadcast %cst_11 : f32 to vector<128x256xf32>
    %56 = arith.addf %54, %55 : vector<128x256xf32>
    %57 = arith.mulf %56, %37 : vector<128x256xf32>
    %cst_12 = arith.constant 6.28318548 : f32
    %58 = vector.broadcast %cst_12 : f32 to vector<128x256xf32>
    %59 = arith.addf %57, %58 : vector<128x256xf32>
    %60 = arith.mulf %36, %59 : vector<128x256xf32>
    %c0_13 = arith.constant 0 : index
    %c0_14 = arith.constant 0 : index
    %61 = vector.load %arg3[%c0_13, %c0_14] : memref<128x256xf32, #tpu.memory_space<vmem>>, vector<128x256xf32>
    tpu.vector_store %arg3[%c0_13, %c0_14], %60 {strides = array<i32>} : memref<128x256xf32, #tpu.memory_space<vmem>>, vector<128x256xf32>,
    return
  }
  func.func @transform_0(%arg0: i32, %arg1: memref<1x2xi32, #tpu.memory_space<smem>>) -> (i32, i32) {
    %c0_i32 = arith.constant 0 : i32
    %c0_i32_0 = arith.constant 0 : i32
    %c0_i32_1 = arith.constant 0 : i32
    return %c0_i32, %c0_i32_0 : i32, i32
  }
  func.func @transform_1(%arg0: i32, %arg1: memref<1x2xi32, #tpu.memory_space<smem>>) -> (i32, i32) {
    %c0_i32 = arith.constant 0 : i32
    %c0_i32_0 = arith.constant 0 : i32
    return %c0_i32, %arg0 : i32, i32
  }
}

</mosaic_0001>

<bundles_post_ra>
// kernel: tpu_custom_call.1
= control target key start
LH: loop header
LB: loop body
LE: loop exit
PB: predicated region body
PF: predicated region fallthrough
CT: control target
= control target key end

     0   :  { %s1895_s0 = inlined_call_operand.vmem [shape: s32[1,2], index: 0, kind: input, shape index: {}]   ;;  %s1896_s1 = inlined_call_operand.vmem [shape: f32[128,3], index: 1, kind: input, shape index: {}]   ;;  %s1897_s2 = inlined_call_operand.hbm [shape: f32[128,256], index: 2, kind: output, shape index: {}]  }
   0x1   :  { %s7_s11 = sshll.u32 %s1895_s0, 4  ;;  %s8_s11 = int_to_ptr.vmem [resolvable:$true] %s7_s11 }
   0x2   :  { %s1065_s12 = scalar_lea.vmem %s8_s11, 16  ;;  %p1070_p1 = scmp.lt.s32.totalorder %s8_s11, %s8_s11 }
   0x3   :  { %p1066_p0 = scmp.ne.s32.totalorder %s8_s11, %s1065_s12  ;;  %p1071_p2 = scmp.lt.s32.totalorder %s1065_s12, %s1065_s12 }
   0x5   :  { %p1072_p3 = por %p1071_p2, %p1070_p1 }
   0x7   :  { %p1073_p4 = pnand %p1072_p3, %p1066_p0 }
   0x9   :  { %1076 = shalt.err (!%p1073_p4)  }
   0xa   :  { %s1103_s13 = smov [#allocation3]  }
   0xb   :  { %10 = dma.vmem_to_smem %s8_s11, 16, %s1103_s13, [#allocation2] }
   0xc   :  { %1099 = dma.done.wait [#allocation2], 16 }
   0xd   :  { %1100 = vsyncadd [#allocation2], 4294967280 }
   0xe   :  { %12 = sfence }
   0xf   :  { %v45_v0 = vld [vmem:[%s1896_s1 + $0x10] sm:$0xff]  ;;  %v43_v1 = vld [vmem:[%s1896_s1] sm:$0xff]  ;;  %v1104_v2 = vmov 0   ;;  %v46_v3 = vld [vmem:[%s1896_s1 + $0x18] sm:$0xff] }
  0x10   :  { %1060 = vset.pattern.permute.xlu1 %v1104_v2  ;;  %1059 = vset.pattern.permute.xlu0 %v1104_v2  ;;  %v44_v4 = vld [vmem:[%s1896_s1 + $0x8] sm:$0xff] }
  0x11   :  { %71 = vperm.xlu1 %1060, %v45_v0   ;;  %61 = vperm.xlu0 %1059, %v43_v1  }
  0x12   :  { %13 = vsyncpa [#allocation5], 0  ;;  %v48_v5 = vld [vmem:[%s1896_s1 + $0x28] sm:$0xff]  ;;  %v47_v6 = vld [vmem:[%s1896_s1 + $0x20] sm:$0xff]  ;;  %v1105_v17 = vmov 1   ;;  %v1106_v18 = vmov 2   ;;  %v22_v19 = vlaneseq }
  0x13   :  { %v50_v7 = vld [vmem:[%s1896_s1 + $0x38] sm:$0xff]  ;;  %v49_v8 = vld [vmem:[%s1896_s1 + $0x30] sm:$0xff]  ;;  %v52_v9 = vld [vmem:[%s1896_s1 + $0x48] sm:$0xff]  ;;  %s17_s0 = sld [smem:[#allocation3]]  ;;  %s1107_s19 = smov [#allocation4]  }
  0x14   :  { %v51_v10 = vld [vmem:[%s1896_s1 + $0x40] sm:$0xff]  ;;  %v54_v11 = vld [vmem:[%s1896_s1 + $0x58] sm:$0xff]  ;;  %v53_v12 = vld [vmem:[%s1896_s1 + $0x50] sm:$0xff]  ;;  %v23_v20 = vand.u32 127, %v22_v19  ;;  %s1040_s20 = sshll.u32 %s1107_s19, 4  ;;  %s1041_s20 = int_to_ptr.vmem [resolvable:$true] %s1040_s20 }
  0x15   :  { %76 = vperm.xlu1 %1060, %v46_v3   ;;  %66 = vperm.xlu0 %1059, %v44_v4   ;;  %v56_v13 = vld [vmem:[%s1896_s1 + $0x68] sm:$0xff]  ;;  %v55_v14 = vld [vmem:[%s1896_s1 + $0x60] sm:$0xff]  ;;  %v58_v15 = vld [vmem:[%s1896_s1 + $0x78] sm:$0xff]  ;;  %s1077_s21 = scalar_lea.vmem %s1041_s20, 4096  ;;  %p1082_p6 = scmp.lt.s32.totalorder %s1041_s20, %s1041_s20 }
  0x16   :  { %v57_v16 = vld [vmem:[%s1896_s1 + $0x70] sm:$0xff]  ;;  %s1051_s1 = sld [smem:[#allocation3 + $0x1]]  ;;  %v24_v21 = vadd.s32 128, %v23_v20  ;;  %v25_v22 = vcvt.s32.f32 %v23_v20  ;;  %p1078_p5 = scmp.ne.s32.totalorder %s1041_s20, %s1077_s21 }
  0x17   :  { %p1083_p7 = scmp.lt.s32.totalorder %s1077_s21, %s1077_s21 }
  0x18   :  { %v26_v23 = vcvt.s32.f32 %v24_v21 }
  0x19   :  { %86 = vperm.xlu1 %1060, %v48_v5   ;;  %81 = vperm.xlu0 %1059, %v47_v6   ;;  %s18_s18 = scvt.s32.f32 %s17_s0  ;;  %p1084_p8 = por %p1083_p7, %p1082_p6 }
  0x1b   :  { %p1085_p9 = pnand %p1084_p8, %p1078_p5 }
  0x1c   :  { %s21_s17 = scvt.s32.f32 %s1051_s1 }
  0x1d   :  { %96 = vperm.xlu1 %1060, %v50_v7   ;;  %91 = vperm.xlu0 %1059, %v49_v8  }
  0x1e   :  { %v27_v24 = vstv %s21_s17 }
  0x1f   :  { %v28_v25 = vadd.f32 %v27_v24, %v25_v22  ;;  %v29_v26 = vadd.f32 %v27_v24, %v26_v23 }
  0x21   :  { %106 = vperm.xlu1 %1060, %v52_v9   ;;  %101 = vperm.xlu0 %1059, %v51_v10   ;;  %v30_v27 = vadd.f32 0.5, %v28_v25  ;;  %v31_v28 = vadd.f32 0.5, %v29_v26 }
  0x23   :  { %v32_v29 = vmul.f32 0.0625, %v30_v27  ;;  %v33_v30 = vmul.f32 0.0625, %v31_v28 }
  0x25   :  { %116 = vperm.xlu1 %1060, %v54_v11   ;;  %111 = vperm.xlu0 %1059, %v53_v12   ;;  %v34_v33 = vfloor.f32 %v32_v29  ;;  %v35_v34 = vfloor.f32 %v33_v30 }
  0x27   :  { %v36_v37 = vmul.f32 16.0, %v34_v33  ;;  %v37_v38 = vmul.f32 16.0, %v35_v34 }
  0x29   :  { %126 = vperm.xlu1 %1060, %v56_v13   ;;  %121 = vperm.xlu0 %1059, %v55_v14   ;;  %v1186_v41 = vsub.f32 %v28_v25, %v36_v37  ;;  %v1188_v42 = vsub.f32 %v29_v26, %v37_v38 }
  0x2d   :  { %136 = vperm.xlu1 %1060, %v58_v15   ;;  %131 = vperm.xlu0 %1059, %v57_v16  }
  0x31   :  { %1062 = vset.pattern.permute.xlu1 %v1105_v17  ;;  %1061 = vset.pattern.permute.xlu0 %v1105_v17 }
  0x32   :  { %176 = vperm.xlu1 %1062, %v44_v4   ;;  %172 = vperm.xlu0 %1061, %v43_v1  }
  0x36   :  { %180 = vperm.xlu1 %1062, %v45_v0   ;;  %184 = vperm.xlu0 %1061, %v46_v3  }
  0x3a   :  { %188 = vperm.xlu1 %1062, %v47_v6   ;;  %192 = vperm.xlu0 %1061, %v48_v5  }
  0x3e   :  { %196 = vperm.xlu1 %1062, %v49_v8   ;;  %200 = vperm.xlu0 %1061, %v50_v7  }
  0x42   :  { %204 = vperm.xlu1 %1062, %v51_v10   ;;  %208 = vperm.xlu0 %1061, %v52_v9  }
  0x46   :  { %212 = vperm.xlu1 %1062, %v53_v12   ;;  %216 = vperm.xlu0 %1061, %v54_v11  }
  0x4a   :  { %220 = vperm.xlu1 %1062, %v55_v14   ;;  %224 = vperm.xlu0 %1061, %v56_v13  }
  0x4e   :  { %228 = vperm.xlu1 %1062, %v57_v16   ;;  %232 = vperm.xlu0 %1061, %v58_v15  }
  0x52   :  { %1063 = vset.pattern.permute.xlu1 %v1106_v18  ;;  %1064 = vset.pattern.permute.xlu0 %v1106_v18 }
  0x53   :  { %300 = vperm.xlu1 %1063, %v43_v1   ;;  %304 = vperm.xlu0 %1064, %v44_v4  }
  0x57   :  { %308 = vperm.xlu1 %1063, %v45_v0   ;;  %316 = vperm.xlu0 %1064, %v47_v6  }
  0x5b   :  { %312 = vperm.xlu1 %1063, %v46_v3   ;;  %324 = vperm.xlu0 %1064, %v49_v8  }
  0x5f   :  { %320 = vperm.xlu1 %1063, %v48_v5   ;;  %332 = vperm.xlu0 %1064, %v51_v10  }
  0x63   :  { %328 = vperm.xlu1 %1063, %v50_v7   ;;  %340 = vperm.xlu0 %1064, %v53_v12   ;;  %v40_v7 = vstv %s18_s18 }
  0x64   :  { %v1238_v10 = vadd.f32 %v40_v7, %v34_v33 }
  0x67   :  { %336 = vperm.xlu1 %1063, %v52_v9   ;;  %348 = vperm.xlu0 %1064, %v55_v14  }
  0x6b   :  { %344 = vperm.xlu1 %1063, %v54_v11   ;;  %356 = vperm.xlu0 %1064, %v57_v16   ;;  %v1240_v11 = vadd.f32 %v40_v7, %v35_v34 }
  0x6f   :  { %352 = vperm.xlu1 %1063, %v56_v13  }
  0x73   :  { %360 = vperm.xlu1 %1063, %v58_v15  }
  0x90   :  { %v1176_v31 = vpop.permute.xlu1 %71  ;;  %v1178_v32 = vpop.permute.xlu0 %61 }
  0x94   :  { %v1180_v35 = vpop.permute.xlu1 %76  ;;  %v1182_v36 = vpop.permute.xlu0 %66 }
  0x98   :  { %v87_v39 = vpop.permute.xlu1 %86  ;;  %v1184_v40 = vpop.permute.xlu0 %81 }
  0x99   :  { %v149_v14 = vmul.f32 %v87_v39, %v1186_v41  ;;  %v150_v15 = vmul.f32 %v87_v39, %v1188_v42  ;;  %v143_v39 = vmul.f32 %v1176_v31, %v1186_v41 }
  0x9c   :  { %v97_v43 = vpop.permute.xlu1 %96  ;;  %v1190_v44 = vpop.permute.xlu0 %91 }
  0x9d   :  { %v153_v45 = vmul.f32 %v97_v43, %v1186_v41  ;;  %v154_v46 = vmul.f32 %v97_v43, %v1188_v42  ;;  %v1278_v43 = vmul.f32 %v1176_v31, %v1188_v42  ;;  %v145_v31 = vmul.f32 %v1180_v35, %v1186_v41 }
  0xa0   :  { %v107_v47 = vpop.permute.xlu1 %106  ;;  %v1194_v48 = vpop.permute.xlu0 %101 }
  0xa1   :  { %v157_v49 = vmul.f32 %v107_v47, %v1186_v41  ;;  %v158_v50 = vmul.f32 %v107_v47, %v1188_v42  ;;  %v156_v28 = vmul.f32 %v1194_v48, %v1188_v42 }
  0xa4   :  { %v117_v51 = vpop.permute.xlu1 %116  ;;  %v112_v52 = vpop.permute.xlu0 %111 }
  0xa5   :  { %v1199_v53 = vmul.f32 %v117_v51, %v1186_v41  ;;  %v1202_v54 = vmul.f32 %v117_v51, %v1188_v42  ;;  %v159_v55 = vmul.f32 %v112_v52, %v1186_v41  ;;  %v160_v56 = vmul.f32 %v112_v52, %v1188_v42 }
  0xa8   :  { %v127_v57 = vpop.permute.xlu1 %126  ;;  %v122_v58 = vpop.permute.xlu0 %121 }
  0xa9   :  { %v1207_v59 = vmul.f32 %v127_v57, %v1186_v41  ;;  %v1210_v60 = vmul.f32 %v127_v57, %v1188_v42  ;;  %v1213_v61 = vmul.f32 %v122_v58, %v1186_v41  ;;  %v1216_v62 = vmul.f32 %v122_v58, %v1188_v42 }
  0xaa   :  { %v140_v57 = vmul.f32 %v1178_v32, %v1188_v42  ;;  %v146_v58 = vmul.f32 %v1180_v35, %v1188_v42  ;;  %v148_v35 = vmul.f32 %v1184_v40, %v1188_v42 }
  0xac   :  { %v137_v63 = vpop.permute.xlu1 %136  ;;  %v132_v0 = vpop.permute.xlu0 %131 }
  0xad   :  { %v1219_v1 = vmul.f32 %v137_v63, %v1186_v41  ;;  %v1222_v2 = vmul.f32 %v137_v63, %v1188_v42  ;;  %v1225_v3 = vmul.f32 %v132_v0, %v1186_v41  ;;  %v1228_v4 = vmul.f32 %v132_v0, %v1188_v42 }
  0xae   :  { %v141_v63 = vmul.f32 %v1182_v36, %v1186_v41 }
  0xb1   :  { %v1230_v5 = vpop.permute.xlu1 %176  ;;  %v1232_v6 = vpop.permute.xlu0 %172 }
  0xb5   :  { %v1234_v8 = vpop.permute.xlu1 %180  ;;  %v1236_v9 = vpop.permute.xlu0 %184 }
  0xb9   :  { %v1242_v12 = vpop.permute.xlu1 %188  ;;  %v193_v13 = vpop.permute.xlu0 %192 }
  0xba   :  { %v245_v16 = vmul.f32 %v193_v13, %v1238_v10  ;;  %v246_v17 = vmul.f32 %v193_v13, %v1240_v11 }
  0xbc   :  { %v1248_v18 = vadd.f32 %v245_v16, %v149_v14  ;;  %v1250_v19 = vadd.f32 %v246_v17, %v150_v15  ;;  %v147_v15 = vmul.f32 %v1184_v40, %v1186_v41  ;;  %v155_v40 = vmul.f32 %v1194_v48, %v1186_v41 }
  0xbd   :  { %v1252_v20 = vpop.permute.xlu1 %196  ;;  %v201_v21 = vpop.permute.xlu0 %200 }
  0xbe   :  { %v249_v22 = vmul.f32 %v201_v21, %v1238_v10  ;;  %v250_v23 = vmul.f32 %v201_v21, %v1240_v11 }
  0xc0   :  { %v1256_v24 = vadd.f32 %v249_v22, %v153_v45  ;;  %v1258_v25 = vadd.f32 %v250_v23, %v154_v46  ;;  %v139_v45 = vmul.f32 %v1178_v32, %v1186_v41  ;;  %v142_v32 = vmul.f32 %v1182_v36, %v1188_v42 }
  0xc1   :  { %v1260_v26 = vpop.permute.xlu1 %204  ;;  %v209_v27 = vpop.permute.xlu0 %208  ;;  %v151_v36 = vmul.f32 %v1190_v44, %v1186_v41  ;;  %v152_v22 = vmul.f32 %v1190_v44, %v1188_v42  ;;  %v237_v23 = vmul.f32 %v1230_v5, %v1238_v10  ;;  %v238_v42 = vmul.f32 %v1230_v5, %v1240_v11 }
  0xc2   :  { %v252_v29 = vmul.f32 %v1260_v26, %v1240_v11  ;;  %v253_v30 = vmul.f32 %v209_v27, %v1238_v10  ;;  %v254_v33 = vmul.f32 %v209_v27, %v1240_v11  ;;  %v236_v41 = vmul.f32 %v1232_v6, %v1240_v11 }
  0xc3   :  { %v239_v44 = vmul.f32 %v1234_v8, %v1238_v10  ;;  %v240_v5 = vmul.f32 %v1234_v8, %v1240_v11 }
  0xc4   :  { %v1268_v34 = vadd.f32 %v252_v29, %v156_v28  ;;  %v1270_v37 = vadd.f32 %v253_v30, %v157_v49  ;;  %v1272_v38 = vadd.f32 %v254_v33, %v158_v50 }
  0xc5   :  { %v213_v46 = vpop.permute.xlu1 %212  ;;  %v217_v47 = vpop.permute.xlu0 %216 }
  0xc6   :  { %v255_v51 = vmul.f32 %v213_v46, %v1238_v10  ;;  %v256_v52 = vmul.f32 %v213_v46, %v1240_v11  ;;  %v257_v49 = vmul.f32 %v217_v47, %v1238_v10  ;;  %v258_v50 = vmul.f32 %v217_v47, %v1240_v11 }
  0xc7   :  { %v242_v47 = vmul.f32 %v1236_v9, %v1240_v11 }
  0xc8   :  { %v1294_v0 = vadd.f32 %v255_v51, %v159_v55  ;;  %v1296_v7 = vadd.f32 %v256_v52, %v160_v56  ;;  %v1299_v13 = vadd.f32 %v257_v49, %v1199_v53  ;;  %v1302_v14 = vadd.f32 %v258_v50, %v1202_v54 }
  0xc9   :  { %v235_v55 = vmul.f32 %v1232_v6, %v1238_v10  ;;  %v221_v56 = vpop.permute.xlu1 %220  ;;  %v225_v16 = vpop.permute.xlu0 %224  ;;  %v241_v6 = vmul.f32 %v1236_v9, %v1238_v10  ;;  %v268_v50 = vadd.f32 %v236_v41, %v140_v57  ;;  %v244_v9 = vmul.f32 %v1242_v12, %v1240_v11 }
  0xca   :  { %v259_v53 = vmul.f32 %v221_v56, %v1238_v10  ;;  %v260_v17 = vmul.f32 %v221_v56, %v1240_v11  ;;  %v261_v54 = vmul.f32 %v225_v16, %v1238_v10  ;;  %v262_v21 = vmul.f32 %v225_v16, %v1240_v11 }
  0xcb   :  { %v267_v33 = vadd.f32 %v235_v55, %v139_v45  ;;  %v243_v45 = vmul.f32 %v1242_v12, %v1238_v10  ;;  %v269_v55 = vadd.f32 %v237_v23, %v141_v63  ;;  %v270_v56 = vadd.f32 %v238_v42, %v142_v32 }
  0xcc   :  { %v1325_v27 = vadd.f32 %v259_v53, %v1213_v61  ;;  %v1328_v28 = vadd.f32 %v260_v17, %v1216_v62  ;;  %v1331_v29 = vadd.f32 %v261_v54, %v1207_v59  ;;  %v1334_v30 = vadd.f32 %v262_v21, %v1210_v60 }
  0xcd   :  { %v229_v48 = vpop.permute.xlu1 %228  ;;  %v233_v61 = vpop.permute.xlu0 %232  ;;  %v271_v16 = vadd.f32 %v239_v44, %v143_v39  ;;  %v272_v39 = vadd.f32 %v240_v5, %v1278_v43  ;;  %v275_v32 = vadd.f32 %v243_v45, %v147_v15  ;;  %v273_v21 = vadd.f32 %v241_v6, %v145_v31 }
  0xce   :  { %v263_v62 = vmul.f32 %v229_v48, %v1238_v10  ;;  %v264_v59 = vmul.f32 %v229_v48, %v1240_v11  ;;  %v265_v46 = vmul.f32 %v233_v61, %v1238_v10  ;;  %v266_v60 = vmul.f32 %v233_v61, %v1240_v11 }
  0xcf   :  { %v1375_v12 = vadd.f32 %v242_v47, %v146_v58  ;;  %v276_v48 = vadd.f32 %v244_v9, %v148_v35 }
  0xd0   :  { %v1355_v51 = vadd.f32 %v263_v62, %v1225_v3  ;;  %v1358_v52 = vadd.f32 %v264_v59, %v1228_v4  ;;  %v1361_v49 = vadd.f32 %v265_v46, %v1219_v1  ;;  %v1364_v8 = vadd.f32 %v266_v60, %v1222_v2 }
  0xd1   :  { %v247_v3 = vmul.f32 %v1252_v20, %v1238_v10  ;;  %v248_v4 = vmul.f32 %v1252_v20, %v1240_v11  ;;  %v251_v1 = vmul.f32 %v1260_v26, %v1238_v10 }
  0xd2   :  { %v301_v53 = vpop.permute.xlu1 %300  ;;  %v305_v17 = vpop.permute.xlu0 %304 }
  0xd3   :  { %v363_v2 = vadd.f32 %v301_v53, %v267_v33  ;;  %v364_v54 = vadd.f32 %v301_v53, %v268_v50  ;;  %v365_v57 = vadd.f32 %v305_v17, %v269_v55  ;;  %v366_v63 = vadd.f32 %v305_v17, %v270_v56 }
  0xd4   :  { %v279_v10 = vadd.f32 %v247_v3, %v151_v36  ;;  %v1377_v26 = vadd.f32 %v248_v4, %v152_v22  ;;  %v1379_v61 = vadd.f32 %v251_v1, %v155_v40 }
  0xd5   :  { %v395_v23 = vadd.f32 0.5, %v363_v2  ;;  %v396_v42 = vadd.f32 0.5, %v364_v54  ;;  %v397_v41 = vadd.f32 0.5, %v365_v57  ;;  %v398_v44 = vadd.f32 0.5, %v366_v63 }
  0xd6   :  { %v309_v11 = vpop.permute.xlu1 %308  ;;  %v317_v20 = vpop.permute.xlu0 %316 }
  0xd7   :  { %v427_v33 = vfloor.f32 %v395_v23  ;;  %v428_v62 = vfloor.f32 %v396_v42  ;;  %v429_v59 = vfloor.f32 %v397_v41  ;;  %v430_v43 = vfloor.f32 %v398_v44 }
  0xd8   :  { %v367_v15 = vadd.f32 %v309_v11, %v271_v16  ;;  %v368_v31 = vadd.f32 %v309_v11, %v272_v39  ;;  %v371_v58 = vadd.f32 %v317_v20, %v275_v32  ;;  %v372_v46 = vadd.f32 %v317_v20, %v276_v48 }
  0xd9   :  { %v1381_v60 = vsub.f32 %v363_v2, %v427_v33  ;;  %v1383_v5 = vsub.f32 %v364_v54, %v428_v62  ;;  %v1385_v6 = vsub.f32 %v365_v57, %v429_v59  ;;  %v1387_v35 = vsub.f32 %v366_v63, %v430_v43 }
  0xda   :  { %v399_v36 = vadd.f32 0.5, %v367_v15  ;;  %v400_v22 = vadd.f32 0.5, %v368_v31  ;;  %v403_v40 = vadd.f32 0.5, %v371_v58  ;;  %v404_v47 = vadd.f32 0.5, %v372_v46  ;;  %v313_v45 = vpop.permute.xlu1 %312 }
  0xdb   :  { %v1391_v50 = vmul.f32 %v1381_v60, %v1381_v60  ;;  %v1395_v55 = vmul.f32 %v1383_v5, %v1383_v5  ;;  %v1399_v56 = vmul.f32 %v1385_v6, %v1385_v6  ;;  %v1403_v16 = vmul.f32 %v1387_v35, %v1387_v35 }
  0xdc   :  { %v431_v9 = vfloor.f32 %v399_v36  ;;  %v432_v3 = vfloor.f32 %v400_v22  ;;  %v435_v4 = vfloor.f32 %v403_v40  ;;  %v436_v1 = vfloor.f32 %v404_v47 }
  0xdd   :  { %v523_v53 = vmul.f32 -0.6160274, %v1391_v50  ;;  %v524_v17 = vmul.f32 -0.6160274, %v1395_v55  ;;  %v525_v2 = vmul.f32 -0.6160274, %v1399_v56  ;;  %v1408_v54 = vadd.f32 %v313_v45, %v273_v21 }
  0xde   :  { %v526_v57 = vmul.f32 -0.6160274, %v1403_v16  ;;  %v1411_v63 = vsub.f32 %v367_v15, %v431_v9  ;;  %v1413_v39 = vsub.f32 %v368_v31, %v432_v3  ;;  %v1415_v32 = vsub.f32 %v371_v58, %v435_v4  ;;  %v325_v15 = vpop.permute.xlu0 %324 }
  0xdf   :  { %v555_v23 = vadd.f32 3.7768927, %v523_v53  ;;  %v556_v42 = vadd.f32 3.7768927, %v524_v17  ;;  %v557_v41 = vadd.f32 3.7768927, %v525_v2  ;;  %v1417_v44 = vsub.f32 %v372_v46, %v436_v1 }
  0xe0   :  { %v558_v11 = vadd.f32 3.7768927, %v526_v57  ;;  %v1421_v20 = vmul.f32 %v1411_v63, %v1411_v63  ;;  %v1425_v21 = vmul.f32 %v1413_v39, %v1413_v39  ;;  %v1429_v48 = vmul.f32 %v1415_v32, %v1415_v32 }
  0xe1   :  { %v587_v33 = vmul.f32 %v555_v23, %v1391_v50  ;;  %v588_v62 = vmul.f32 %v556_v42, %v1395_v55  ;;  %v589_v59 = vmul.f32 %v557_v41, %v1399_v56  ;;  %v1436_v43 = vmul.f32 %v1417_v44, %v1417_v44 }
  0xe2   :  { %v590_v31 = vmul.f32 %v558_v11, %v1403_v16  ;;  %v527_v58 = vmul.f32 -0.6160274, %v1421_v20  ;;  %v528_v46 = vmul.f32 -0.6160274, %v1425_v21  ;;  %v531_v36 = vmul.f32 -0.6160274, %v1429_v48 }
  0xe3   :  { %v619_v22 = vadd.f32 -15.084919, %v587_v33  ;;  %v620_v40 = vadd.f32 -15.084919, %v588_v62  ;;  %v621_v47 = vadd.f32 -15.084919, %v589_v59  ;;  %v1443_v9 = vadd.f32 %v313_v45, %v1375_v12 }
  0xe4   :  { %v622_v3 = vadd.f32 -15.084919, %v590_v31  ;;  %v559_v4 = vadd.f32 3.7768927, %v527_v58  ;;  %v560_v1 = vadd.f32 3.7768927, %v528_v46  ;;  %v1445_v53 = vadd.f32 %v325_v15, %v279_v10 }
  0xe5   :  { %v651_v17 = vmul.f32 %v619_v22, %v1391_v50  ;;  %v652_v2 = vmul.f32 %v620_v40, %v1395_v55  ;;  %v653_v57 = vmul.f32 %v621_v47, %v1399_v56  ;;  %v532_v23 = vmul.f32 -0.6160274, %v1436_v43 }
  0xe6   :  { %v654_v42 = vmul.f32 %v622_v3, %v1403_v16  ;;  %v591_v41 = vmul.f32 %v559_v4, %v1421_v20  ;;  %v592_v12 = vmul.f32 %v560_v1, %v1425_v21  ;;  %v563_v45 = vadd.f32 3.7768927, %v531_v36 }
  0xe7   :  { %v683_v11 = vadd.f32 42.05744, %v651_v17  ;;  %v684_v33 = vadd.f32 42.05744, %v652_v2  ;;  %v685_v62 = vadd.f32 42.05744, %v653_v57  ;;  %v1455_v10 = vadd.f32 %v325_v15, %v1377_v26 }
  0xe8   :  { %v686_v59 = vadd.f32 42.05744, %v654_v42  ;;  %v623_v31 = vadd.f32 -15.084919, %v591_v41  ;;  %v624_v58 = vadd.f32 -15.084919, %v592_v12  ;;  %v595_v46 = vmul.f32 %v563_v45, %v1429_v48 }
  0xe9   :  { %v715_v22 = vmul.f32 %v683_v11, %v1391_v50  ;;  %v716_v40 = vmul.f32 %v684_v33, %v1395_v55  ;;  %v717_v47 = vmul.f32 %v685_v62, %v1399_v56  ;;  %v564_v3 = vadd.f32 3.7768927, %v532_v23 }
  0xea   :  { %v718_v36 = vmul.f32 %v686_v59, %v1403_v16  ;;  %v655_v4 = vmul.f32 %v623_v31, %v1421_v20  ;;  %v656_v1 = vmul.f32 %v624_v58, %v1425_v21  ;;  %v627_v26 = vadd.f32 -15.084919, %v595_v46 }
  0xeb   :  { %v747_v15 = vadd.f32 -76.70577, %v715_v22  ;;  %v748_v17 = vadd.f32 -76.70577, %v716_v40  ;;  %v749_v2 = vadd.f32 -76.70577, %v717_v47  ;;  %v596_v57 = vmul.f32 %v564_v3, %v1436_v43 }
  0xec   :  { %v750_v42 = vadd.f32 -76.70577, %v718_v36  ;;  %v687_v41 = vadd.f32 42.05744, %v655_v4  ;;  %v688_v12 = vadd.f32 42.05744, %v656_v1  ;;  %v659_v45 = vmul.f32 %v627_v26, %v1429_v48 }
  0xed   :  { %v779_v11 = vmul.f32 %v747_v15, %v1391_v50  ;;  %v780_v23 = vmul.f32 %v748_v17, %v1395_v55  ;;  %v781_v33 = vmul.f32 %v749_v2, %v1399_v56  ;;  %v628_v62 = vadd.f32 -15.084919, %v596_v57 }
  0xee   :  { %v782_v59 = vmul.f32 %v750_v42, %v1403_v16  ;;  %v719_v31 = vmul.f32 %v687_v41, %v1421_v20  ;;  %v720_v58 = vmul.f32 %v688_v12, %v1425_v21  ;;  %v691_v46 = vadd.f32 42.05744, %v659_v45 }
  0xef   :  { %v811_v22 = vadd.f32 81.60525, %v779_v11  ;;  %v812_v40 = vadd.f32 81.60525, %v780_v23  ;;  %v813_v47 = vadd.f32 81.60525, %v781_v33  ;;  %v660_v3 = vmul.f32 %v628_v62, %v1436_v43 }
  0xf0   :  { %v814_v36 = vadd.f32 81.60525, %v782_v59  ;;  %v751_v4 = vadd.f32 -76.70577, %v719_v31  ;;  %v752_v1 = vadd.f32 -76.70577, %v720_v58  ;;  %v723_v26 = vmul.f32 %v691_v46, %v1429_v48 }
  0xf1   :  { %v843_v15 = vmul.f32 %v811_v22, %v1391_v50  ;;  %v844_v17 = vmul.f32 %v812_v40, %v1395_v55  ;;  %v845_v2 = vmul.f32 %v813_v47, %v1399_v56  ;;  %v692_v57 = vadd.f32 42.05744, %v660_v3 }
  0xf2   :  { %v846_v42 = vmul.f32 %v814_v36, %v1403_v16  ;;  %v783_v41 = vmul.f32 %v751_v4, %v1421_v20  ;;  %v784_v12 = vmul.f32 %v752_v1, %v1425_v21  ;;  %v755_v45 = vadd.f32 -76.70577, %v723_v26 }
  0xf3   :  { %v875_v11 = vadd.f32 -41.3417, %v843_v15  ;;  %v876_v23 = vadd.f32 -41.3417, %v844_v17  ;;  %v877_v33 = vadd.f32 -41.3417, %v845_v2  ;;  %v724_v62 = vmul.f32 %v692_v57, %v1436_v43 }
  0xf4   :  { %v878_v59 = vadd.f32 -41.3417, %v846_v42  ;;  %v815_v31 = vadd.f32 81.60525, %v783_v41  ;;  %v816_v58 = vadd.f32 81.60525, %v784_v12  ;;  %v787_v46 = vmul.f32 %v755_v45, %v1429_v48 }
  0xf5   :  { %v907_v22 = vmul.f32 %v875_v11, %v1391_v50  ;;  %v908_v40 = vmul.f32 %v876_v23, %v1395_v55  ;;  %v909_v47 = vmul.f32 %v877_v33, %v1399_v56  ;;  %v756_v3 = vadd.f32 -76.70577, %v724_v62 }
  0xf6   :  { %v910_v36 = vmul.f32 %v878_v59, %v1403_v16  ;;  %v847_v4 = vmul.f32 %v815_v31, %v1421_v20  ;;  %v848_v1 = vmul.f32 %v816_v58, %v1425_v21  ;;  %v819_v26 = vadd.f32 81.60525, %v787_v46 }
  0xf7   :  { %v939_v15 = vadd.f32 6.2831855, %v907_v22  ;;  %v940_v17 = vadd.f32 6.2831855, %v908_v40  ;;  %v941_v2 = vadd.f32 6.2831855, %v909_v47  ;;  %v788_v57 = vmul.f32 %v756_v3, %v1436_v43 }
  0xf8   :  { %v942_v42 = vadd.f32 6.2831855, %v910_v36  ;;  %v879_v41 = vadd.f32 -41.3417, %v847_v4  ;;  %v880_v50 = vadd.f32 -41.3417, %v848_v1  ;;  %v851_v55 = vmul.f32 %v819_v26, %v1429_v48 }
  0xf9   :  { %v971_v56 = vmul.f32 %v939_v15, %v1381_v60  ;;  %v972_v12 = vmul.f32 %v940_v17, %v1383_v5  ;;  %v973_v16 = vmul.f32 %v941_v2, %v1385_v6  ;;  %v820_v45 = vadd.f32 81.60525, %v788_v57  ;;  %v333_v2 = vpop.permute.xlu0 %332 }
  0xfa   :  { %v974_v11 = vmul.f32 %v942_v42, %v1387_v35  ;;  %v911_v23 = vmul.f32 %v879_v41, %v1421_v20  ;;  %v912_v33 = vmul.f32 %v880_v50, %v1425_v21  ;;  %v883_v62 = vadd.f32 -41.3417, %v851_v55  ;;  %v321_v21 = vpop.permute.xlu1 %320 }
  0xfb   :  { %1003 = vst [vmem:[#allocation4] sm:$0xff] %v971_v56  ;;  %1004 = vst [vmem:[#allocation4 + $0x8] sm:$0xff] %v972_v12  ;;  %v852_v59 = vmul.f32 %v820_v45, %v1436_v43  ;;  %v401_v31 = vadd.f32 0.5, %v1408_v54  ;;  %v402_v60 = vadd.f32 0.5, %v1443_v9  ;;  %v407_v5 = vadd.f32 0.5, %v1445_v53 }
  0xfc   :  { %1005 = vst [vmem:[#allocation4 + $0x10] sm:$0xff] %v973_v16  ;;  %1006 = vst [vmem:[#allocation4 + $0x18] sm:$0xff] %v974_v11  ;;  %v943_v6 = vadd.f32 6.2831855, %v911_v23  ;;  %v944_v58 = vadd.f32 6.2831855, %v912_v33  ;;  %v915_v35 = vmul.f32 %v883_v62, %v1429_v48  ;;  %v373_v57 = vadd.f32 %v321_v21, %v1248_v18 }
  0xfd   :  { %v408_v20 = vadd.f32 0.5, %v1455_v10  ;;  %v884_v46 = vadd.f32 -41.3417, %v852_v59  ;;  %v433_v22 = vfloor.f32 %v401_v31  ;;  %v434_v40 = vfloor.f32 %v402_v60 }
  0xfe   :  { %v439_v47 = vfloor.f32 %v407_v5  ;;  %v975_v3 = vmul.f32 %v943_v6, %v1411_v63  ;;  %v976_v36 = vmul.f32 %v944_v58, %v1413_v39  ;;  %v947_v4 = vadd.f32 6.2831855, %v915_v35  ;;  %v329_v41 = vpop.permute.xlu1 %328 }
  0xff   :  { %v440_v1 = vfloor.f32 %v408_v20  ;;  %v916_v26 = vmul.f32 %v884_v46, %v1436_v43  ;;  %v1506_v15 = vsub.f32 %v1408_v54, %v433_v22  ;;  %v1509_v48 = vsub.f32 %v1443_v9, %v434_v40 }
 0x100   :  { %v1512_v17 = vsub.f32 %v1445_v53, %v439_v47  ;;  %1007 = vst [vmem:[#allocation4 + $0x20] sm:$0xff] %v975_v3  ;;  %1008 = vst [vmem:[#allocation4 + $0x28] sm:$0xff] %v976_v36  ;;  %v979_v63 = vmul.f32 %v947_v4, %v1415_v32  ;;  %v374_v43 = vadd.f32 %v321_v21, %v1250_v19  ;;  %v405_v18 = vadd.f32 0.5, %v373_v57 }
 0x101   :  { %v1516_v39 = vsub.f32 %v1455_v10, %v440_v1  ;;  %v948_v54 = vadd.f32 6.2831855, %v916_v26  ;;  %v1522_v9 = vmul.f32 %v1506_v15, %v1506_v15  ;;  %v1526_v53 = vmul.f32 %v1509_v48, %v1509_v48 }
 0x102   :  { %v1530_v42 = vmul.f32 %v1512_v17, %v1512_v17  ;;  %1011 = vst [vmem:[#allocation4 + $0x40] sm:$0xff] %v979_v63  ;;  %v406_v19 = vadd.f32 0.5, %v374_v43  ;;  %v379_v10 = vadd.f32 %v333_v2, %v1379_v61  ;;  %v437_v45 = vfloor.f32 %v405_v18 }
 0x103   :  { %v1534_v32 = vmul.f32 %v1516_v39, %v1516_v39  ;;  %v980_v50 = vmul.f32 %v948_v54, %v1417_v44  ;;  %v529_v55 = vmul.f32 -0.6160274, %v1522_v9  ;;  %v530_v56 = vmul.f32 -0.6160274, %v1526_v53 }
 0x104   :  { %v535_v12 = vmul.f32 -0.6160274, %v1530_v42  ;;  %v438_v11 = vfloor.f32 %v406_v19  ;;  %v380_v23 = vadd.f32 %v333_v2, %v1268_v34  ;;  %v1544_v61 = vadd.f32 %v329_v41, %v1256_v24 }
 0x105   :  { %v536_v16 = vmul.f32 -0.6160274, %v1534_v32  ;;  %1012 = vst [vmem:[#allocation4 + $0x48] sm:$0xff] %v980_v50  ;;  %v561_v33 = vadd.f32 3.7768927, %v529_v55  ;;  %v1546_v31 = vsub.f32 %v373_v57, %v437_v45  ;;  %v411_v5 = vadd.f32 0.5, %v379_v10 }
 0x106   :  { %v562_v62 = vadd.f32 3.7768927, %v530_v56  ;;  %v567_v59 = vadd.f32 3.7768927, %v535_v12  ;;  %v1548_v60 = vsub.f32 %v374_v43, %v438_v11  ;;  %v412_v34 = vadd.f32 0.5, %v380_v23 }
 0x107   :  { %v568_v44 = vadd.f32 3.7768927, %v536_v16  ;;  %v593_v6 = vmul.f32 %v561_v33, %v1522_v9  ;;  %v1556_v21 = vmul.f32 %v1546_v31, %v1546_v31  ;;  %v443_v46 = vfloor.f32 %v411_v5 }
 0x108   :  { %v594_v58 = vmul.f32 %v562_v62, %v1526_v53  ;;  %v599_v35 = vmul.f32 %v567_v59, %v1530_v42  ;;  %v1560_v24 = vmul.f32 %v1548_v60, %v1548_v60  ;;  %v444_v3 = vfloor.f32 %v412_v34 }
 0x109   :  { %v600_v20 = vmul.f32 %v568_v44, %v1534_v32  ;;  %v625_v22 = vadd.f32 -15.084919, %v593_v6  ;;  %v533_v4 = vmul.f32 -0.6160274, %v1556_v21  ;;  %v1564_v26 = vsub.f32 %v379_v10, %v443_v46 }
 0x10a   :  { %v626_v40 = vadd.f32 -15.084919, %v594_v58  ;;  %v631_v47 = vadd.f32 -15.084919, %v599_v35  ;;  %v534_v1 = vmul.f32 -0.6160274, %v1560_v24  ;;  %v1569_v43 = vsub.f32 %v380_v23, %v444_v3 }
 0x10b   :  { %v632_v36 = vadd.f32 -15.084919, %v600_v20  ;;  %v657_v2 = vmul.f32 %v625_v22, %v1522_v9  ;;  %v565_v18 = vadd.f32 3.7768927, %v533_v4  ;;  %v1574_v50 = vmul.f32 %v1564_v26, %v1564_v26  ;;  %v1593_v4 = vpop.permute.xlu0 %340 }
 0x10c   :  { %v658_v63 = vmul.f32 %v626_v40, %v1526_v53  ;;  %v663_v57 = vmul.f32 %v631_v47, %v1530_v42  ;;  %v566_v19 = vadd.f32 3.7768927, %v534_v1  ;;  %v1578_v12 = vmul.f32 %v1569_v43, %v1569_v43 }
 0x10d   :  { %v664_v54 = vmul.f32 %v632_v36, %v1534_v32  ;;  %v689_v55 = vadd.f32 42.05744, %v657_v2  ;;  %v597_v45 = vmul.f32 %v565_v18, %v1556_v21  ;;  %v539_v23 = vmul.f32 -0.6160274, %v1574_v50 }
 0x10e   :  { %v690_v56 = vadd.f32 42.05744, %v658_v63  ;;  %v695_v10 = vadd.f32 42.05744, %v663_v57  ;;  %v598_v11 = vmul.f32 %v566_v19, %v1560_v24  ;;  %v540_v44 = vmul.f32 -0.6160274, %v1578_v12 }
 0x10f   :  { %v696_v16 = vadd.f32 42.05744, %v664_v54  ;;  %v721_v33 = vmul.f32 %v689_v55, %v1522_v9  ;;  %v629_v6 = vadd.f32 -15.084919, %v597_v45  ;;  %v571_v35 = vadd.f32 3.7768927, %v539_v23 }
 0x110   :  { %v722_v62 = vmul.f32 %v690_v56, %v1526_v53  ;;  %v727_v59 = vmul.f32 %v695_v10, %v1530_v42  ;;  %v630_v58 = vadd.f32 -15.084919, %v598_v11  ;;  %v1589_v22 = vadd.f32 %v329_v41, %v1258_v25 }
 0x111   :  { %v728_v5 = vmul.f32 %v696_v16, %v1534_v32  ;;  %v753_v34 = vadd.f32 -76.70577, %v721_v33  ;;  %v661_v47 = vmul.f32 %v629_v6, %v1556_v21  ;;  %v572_v36 = vadd.f32 3.7768927, %v540_v44 }
 0x112   :  { %v754_v20 = vadd.f32 -76.70577, %v722_v62  ;;  %v759_v46 = vadd.f32 -76.70577, %v727_v59  ;;  %v662_v3 = vmul.f32 %v630_v58, %v1560_v24  ;;  %v603_v57 = vmul.f32 %v571_v35, %v1574_v50 }
 0x113   :  { %v760_v40 = vadd.f32 -76.70577, %v728_v5  ;;  %v785_v1 = vmul.f32 %v753_v34, %v1522_v9  ;;  %v693_v25 = vadd.f32 42.05744, %v661_v47  ;;  %v604_v18 = vmul.f32 %v572_v36, %v1578_v12 }
 0x114   :  { %v786_v2 = vmul.f32 %v754_v20, %v1526_v53  ;;  %v791_v63 = vmul.f32 %v759_v46, %v1530_v42  ;;  %v694_v41 = vadd.f32 42.05744, %v662_v3  ;;  %v1603_v10 = vadd.f32 %v1593_v4, %v1294_v0 }
 0x115   :  { %v792_v54 = vmul.f32 %v760_v40, %v1534_v32  ;;  %v817_v19 = vadd.f32 81.60525, %v785_v1  ;;  %v725_v45 = vmul.f32 %v693_v25, %v1556_v21  ;;  %v635_v23 = vadd.f32 -15.084919, %v603_v57 }
 0x116   :  { %v818_v55 = vadd.f32 81.60525, %v786_v2  ;;  %v823_v56 = vadd.f32 81.60525, %v791_v63  ;;  %v726_v11 = vmul.f32 %v694_v41, %v1560_v24  ;;  %v636_v44 = vadd.f32 -15.084919, %v604_v18 }
 0x117   :  { %v824_v16 = vadd.f32 81.60525, %v792_v54  ;;  %v849_v33 = vmul.f32 %v817_v19, %v1522_v9  ;;  %v757_v6 = vadd.f32 -76.70577, %v725_v45  ;;  %v667_v0 = vmul.f32 %v635_v23, %v1574_v50 }
 0x118   :  { %v850_v62 = vmul.f32 %v818_v55, %v1526_v53  ;;  %v855_v59 = vmul.f32 %v823_v56, %v1530_v42  ;;  %v758_v58 = vadd.f32 -76.70577, %v726_v11  ;;  %v668_v46 = vmul.f32 %v636_v44, %v1578_v12 }
 0x119   :  { %v856_v5 = vmul.f32 %v824_v16, %v1534_v32  ;;  %v881_v35 = vadd.f32 -41.3417, %v849_v33  ;;  %v789_v47 = vmul.f32 %v757_v6, %v1556_v21  ;;  %v699_v36 = vadd.f32 42.05744, %v667_v0 }
 0x11a   :  { %v882_v34 = vadd.f32 -41.3417, %v850_v62  ;;  %v887_v20 = vadd.f32 -41.3417, %v855_v59  ;;  %v790_v3 = vmul.f32 %v758_v58, %v1560_v24  ;;  %v700_v57 = vadd.f32 42.05744, %v668_v46 }
 0x11b   :  { %v888_v40 = vadd.f32 -41.3417, %v856_v5  ;;  %v913_v1 = vmul.f32 %v881_v35, %v1522_v9  ;;  %v821_v25 = vadd.f32 81.60525, %v789_v47  ;;  %v731_v18 = vmul.f32 %v699_v36, %v1574_v50 }
 0x11c   :  { %v914_v2 = vmul.f32 %v882_v34, %v1526_v53  ;;  %v919_v63 = vmul.f32 %v887_v20, %v1530_v42  ;;  %v822_v41 = vadd.f32 81.60525, %v790_v3  ;;  %v732_v16 = vmul.f32 %v700_v57, %v1578_v12 }
 0x11d   :  { %v920_v54 = vmul.f32 %v888_v40, %v1534_v32  ;;  %v945_v19 = vadd.f32 6.2831855, %v913_v1  ;;  %v853_v11 = vmul.f32 %v821_v25, %v1556_v21  ;;  %v763_v53 = vadd.f32 -76.70577, %v731_v18 }
 0x11e   :  { %v946_v55 = vadd.f32 6.2831855, %v914_v2  ;;  %v951_v56 = vadd.f32 6.2831855, %v919_v63  ;;  %v854_v9 = vmul.f32 %v822_v41, %v1560_v24  ;;  %v764_v33 = vadd.f32 -76.70577, %v732_v16 }
 0x11f   :  { %v952_v45 = vadd.f32 6.2831855, %v920_v54  ;;  %v977_v42 = vmul.f32 %v945_v19, %v1506_v15  ;;  %v885_v59 = vadd.f32 -41.3417, %v853_v11  ;;  %v795_v5 = vmul.f32 %v763_v53, %v1574_v50 }
 0x120   :  { %v978_v23 = vmul.f32 %v946_v55, %v1509_v48  ;;  %v983_v32 = vmul.f32 %v951_v56, %v1512_v17  ;;  %v886_v44 = vadd.f32 -41.3417, %v854_v9  ;;  %v796_v6 = vmul.f32 %v764_v33, %v1578_v12  ;;  %v349_v55 = vpop.permute.xlu0 %348 }
 0x121   :  { %v984_v62 = vmul.f32 %v952_v45, %v1516_v39  ;;  %1009 = vst [vmem:[#allocation4 + $0x30] sm:$0xff] %v977_v42  ;;  %v409_v58 = vadd.f32 0.5, %v1544_v61  ;;  %v410_v15 = vadd.f32 0.5, %v1589_v22  ;;  %v384_v48 = vadd.f32 %v1593_v4, %v1296_v7  ;;  %v337_v4 = vpop.permute.xlu1 %336 }
 0x122   :  { %1010 = vst [vmem:[#allocation4 + $0x38] sm:$0xff] %v978_v23  ;;  %1015 = vst [vmem:[#allocation4 + $0x60] sm:$0xff] %v983_v32  ;;  %v917_v17 = vmul.f32 %v885_v59, %v1556_v21  ;;  %v918_v39 = vmul.f32 %v886_v44, %v1560_v24  ;;  %v827_v0 = vadd.f32 81.60525, %v795_v5  ;;  %v415_v35 = vadd.f32 0.5, %v1603_v10 }
 0x123   :  { %1016 = vst [vmem:[#allocation4 + $0x68] sm:$0xff] %v984_v62  ;;  %v828_v34 = vadd.f32 81.60525, %v796_v6  ;;  %v441_v20 = vfloor.f32 %v409_v58  ;;  %v442_v46 = vfloor.f32 %v410_v15  ;;  %v416_v40 = vadd.f32 0.5, %v384_v48 }
 0x124   :  { %v949_v47 = vadd.f32 6.2831855, %v917_v17  ;;  %v950_v3 = vadd.f32 6.2831855, %v918_v39  ;;  %v859_v36 = vmul.f32 %v827_v0, %v1574_v50  ;;  %v447_v1 = vfloor.f32 %v415_v35 }
 0x125   :  { %v860_v2 = vmul.f32 %v828_v34, %v1578_v12  ;;  %v1639_v7 = vsub.f32 %v1544_v61, %v441_v20  ;;  %v1642_v21 = vsub.f32 %v1589_v22, %v442_v46  ;;  %v448_v24 = vfloor.f32 %v416_v40 }
 0x126   :  { %v981_v63 = vmul.f32 %v949_v47, %v1546_v31  ;;  %v982_v57 = vmul.f32 %v950_v3, %v1548_v60  ;;  %v891_v54 = vadd.f32 -41.3417, %v859_v36  ;;  %v1647_v25 = vsub.f32 %v1603_v10, %v447_v1 }
 0x127   :  { %v892_v41 = vadd.f32 -41.3417, %v860_v2  ;;  %v1651_v18 = vmul.f32 %v1639_v7, %v1639_v7  ;;  %v1655_v61 = vmul.f32 %v1642_v21, %v1642_v21  ;;  %v1657_v22 = vsub.f32 %v384_v48, %v448_v24 }
 0x128   :  { %1013 = vst [vmem:[#allocation4 + $0x50] sm:$0xff] %v981_v63  ;;  %1014 = vst [vmem:[#allocation4 + $0x58] sm:$0xff] %v982_v57  ;;  %v923_v31 = vmul.f32 %v891_v54, %v1574_v50  ;;  %v1662_v60 = vmul.f32 %v1647_v25, %v1647_v25  ;;  %v381_v10 = vadd.f32 %v337_v4, %v1270_v37 }
 0x129   :  { %v382_v19 = vadd.f32 %v337_v4, %v1272_v38  ;;  %v924_v56 = vmul.f32 %v892_v41, %v1578_v12  ;;  %v537_v16 = vmul.f32 -0.6160274, %v1651_v18  ;;  %v538_v45 = vmul.f32 -0.6160274, %v1655_v61 }
 0x12a   :  { %v1671_v11 = vmul.f32 %v1657_v22, %v1657_v22  ;;  %v955_v50 = vadd.f32 6.2831855, %v923_v31  ;;  %v543_v9 = vmul.f32 -0.6160274, %v1662_v60  ;;  %v413_v53 = vadd.f32 0.5, %v381_v10 }
 0x12b   :  { %v414_v42 = vadd.f32 0.5, %v382_v19  ;;  %v956_v23 = vadd.f32 6.2831855, %v924_v56  ;;  %v569_v37 = vadd.f32 3.7768927, %v537_v16  ;;  %v387_v38 = vadd.f32 %v349_v55, %v1325_v27 }
 0x12c   :  { %v570_v32 = vadd.f32 3.7768927, %v538_v45  ;;  %v987_v12 = vmul.f32 %v955_v50, %v1564_v26  ;;  %v544_v33 = vmul.f32 -0.6160274, %v1671_v11  ;;  %v575_v62 = vadd.f32 3.7768927, %v543_v9 }
 0x12d   :  { %v445_v59 = vfloor.f32 %v413_v53  ;;  %v988_v44 = vmul.f32 %v956_v23, %v1569_v43  ;;  %v601_v5 = vmul.f32 %v569_v37, %v1651_v18  ;;  %v446_v58 = vfloor.f32 %v414_v42 }
 0x12e   :  { %v602_v6 = vmul.f32 %v570_v32, %v1655_v61  ;;  %1019 = vst [vmem:[#allocation4 + $0x80] sm:$0xff] %v987_v12  ;;  %v576_v15 = vadd.f32 3.7768927, %v544_v33  ;;  %v607_v48 = vmul.f32 %v575_v62, %v1662_v60  ;;  %v388_v27 = vadd.f32 %v349_v55, %v1328_v28 }
 0x12f   :  { %v1681_v17 = vsub.f32 %v381_v10, %v445_v59  ;;  %1020 = vst [vmem:[#allocation4 + $0x88] sm:$0xff] %v988_v44  ;;  %v633_v26 = vadd.f32 -15.084919, %v601_v5  ;;  %v1684_v0 = vsub.f32 %v382_v19, %v446_v58  ;;  %v419_v35 = vadd.f32 0.5, %v387_v38 }
 0x130   :  { %v634_v39 = vadd.f32 -15.084919, %v602_v6  ;;  %v608_v43 = vmul.f32 %v576_v15, %v1671_v11  ;;  %v639_v34 = vadd.f32 -15.084919, %v607_v48  ;;  %v420_v46 = vadd.f32 0.5, %v388_v27 }
 0x131   :  { %v1689_v20 = vmul.f32 %v1681_v17, %v1681_v17  ;;  %v665_v40 = vmul.f32 %v633_v26, %v1651_v18  ;;  %v1695_v28 = vmul.f32 %v1684_v0, %v1684_v0  ;;  %v451_v3 = vfloor.f32 %v419_v35 }
 0x132   :  { %v666_v47 = vmul.f32 %v634_v39, %v1655_v61  ;;  %v640_v36 = vadd.f32 -15.084919, %v608_v43  ;;  %v671_v1 = vmul.f32 %v639_v34, %v1662_v60  ;;  %v452_v24 = vfloor.f32 %v420_v46 }
 0x133   :  { %v541_v2 = vmul.f32 -0.6160274, %v1689_v20  ;;  %v697_v4 = vadd.f32 42.05744, %v665_v40  ;;  %v542_v57 = vmul.f32 -0.6160274, %v1695_v28  ;;  %v1700_v54 = vsub.f32 %v387_v38, %v451_v3 }
 0x134   :  { %v698_v63 = vadd.f32 42.05744, %v666_v47  ;;  %v672_v41 = vmul.f32 %v640_v36, %v1671_v11  ;;  %v703_v31 = vadd.f32 42.05744, %v671_v1  ;;  %v1703_v19 = vsub.f32 %v388_v27, %v452_v24 }
 0x135   :  { %v573_v10 = vadd.f32 3.7768927, %v541_v2  ;;  %v729_v55 = vmul.f32 %v697_v4, %v1651_v18  ;;  %v574_v16 = vadd.f32 3.7768927, %v542_v57  ;;  %v1709_v45 = vmul.f32 %v1700_v54, %v1700_v54 }
 0x136   :  { %v730_v56 = vmul.f32 %v698_v63, %v1655_v61  ;;  %v704_v50 = vadd.f32 42.05744, %v672_v41  ;;  %v735_v9 = vmul.f32 %v703_v31, %v1662_v60  ;;  %v1715_v42 = vmul.f32 %v1703_v19, %v1703_v19 }
 0x137   :  { %v605_v53 = vmul.f32 %v573_v10, %v1689_v20  ;;  %v761_v23 = vadd.f32 -76.70577, %v729_v55  ;;  %v606_v32 = vmul.f32 %v574_v16, %v1695_v28  ;;  %v547_v38 = vmul.f32 -0.6160274, %v1709_v45 }
 0x138   :  { %v762_v37 = vadd.f32 -76.70577, %v730_v56  ;;  %v736_v12 = vmul.f32 %v704_v50, %v1671_v11  ;;  %v767_v33 = vadd.f32 -76.70577, %v735_v9  ;;  %v548_v59 = vmul.f32 -0.6160274, %v1715_v42 }
 0x139   :  { %v637_v62 = vadd.f32 -15.084919, %v605_v53  ;;  %v793_v44 = vmul.f32 %v761_v23, %v1651_v18  ;;  %v638_v6 = vadd.f32 -15.084919, %v606_v32  ;;  %v579_v58 = vadd.f32 3.7768927, %v547_v38 }
 0x13a   :  { %v794_v5 = vmul.f32 %v762_v37, %v1655_v61  ;;  %v768_v15 = vadd.f32 -76.70577, %v736_v12  ;;  %v799_v48 = vmul.f32 %v767_v33, %v1662_v60  ;;  %v580_v26 = vadd.f32 3.7768927, %v548_v59 }
 0x13b   :  { %v669_v27 = vmul.f32 %v637_v62, %v1689_v20  ;;  %v825_v39 = vadd.f32 81.60525, %v793_v44  ;;  %v670_v43 = vmul.f32 %v638_v6, %v1695_v28  ;;  %v611_v34 = vmul.f32 %v579_v58, %v1709_v45 }
 0x13c   :  { %v826_v35 = vadd.f32 81.60525, %v794_v5  ;;  %v800_v46 = vmul.f32 %v768_v15, %v1671_v11  ;;  %v831_v40 = vadd.f32 81.60525, %v799_v48  ;;  %v612_v3 = vmul.f32 %v580_v26, %v1715_v42 }
 0x13d   :  { %v701_v47 = vadd.f32 42.05744, %v669_v27  ;;  %v857_v36 = vmul.f32 %v825_v39, %v1651_v18  ;;  %v702_v2 = vadd.f32 42.05744, %v670_v43  ;;  %v643_v24 = vadd.f32 -15.084919, %v611_v34  ;;  %v345_v27 = vpop.permute.xlu1 %344  ;;  %v357_v43 = vpop.permute.xlu0 %356 }
 0x13e   :  { %v858_v1 = vmul.f32 %v826_v35, %v1655_v61  ;;  %v832_v4 = vadd.f32 81.60525, %v800_v46  ;;  %v863_v63 = vmul.f32 %v831_v40, %v1662_v60  ;;  %v644_v41 = vadd.f32 -15.084919, %v612_v3 }
 0x13f   :  { %v733_v57 = vmul.f32 %v701_v47, %v1689_v20  ;;  %v889_v31 = vadd.f32 -41.3417, %v857_v36  ;;  %v734_v55 = vmul.f32 %v702_v2, %v1695_v28  ;;  %v675_v56 = vmul.f32 %v643_v24, %v1709_v45 }
 0x140   :  { %v890_v10 = vadd.f32 -41.3417, %v858_v1  ;;  %v864_v16 = vmul.f32 %v832_v4, %v1671_v11  ;;  %v895_v50 = vadd.f32 -41.3417, %v863_v63  ;;  %v676_v53 = vmul.f32 %v644_v41, %v1715_v42 }
 0x141   :  { %v765_v9 = vadd.f32 -76.70577, %v733_v57  ;;  %v921_v23 = vmul.f32 %v889_v31, %v1651_v18  ;;  %v766_v32 = vadd.f32 -76.70577, %v734_v55  ;;  %v707_v38 = vadd.f32 42.05744, %v675_v56 }
 0x142   :  { %v922_v37 = vmul.f32 %v890_v10, %v1655_v61  ;;  %v896_v12 = vadd.f32 -41.3417, %v864_v16  ;;  %v927_v33 = vmul.f32 %v895_v50, %v1662_v60  ;;  %v708_v59 = vadd.f32 42.05744, %v676_v53  ;;  %v353_v53 = vpop.permute.xlu1 %352 }
 0x143   :  { %v797_v62 = vmul.f32 %v765_v9, %v1689_v20  ;;  %v953_v44 = vadd.f32 6.2831855, %v921_v23  ;;  %v798_v6 = vmul.f32 %v766_v32, %v1695_v28  ;;  %v739_v58 = vmul.f32 %v707_v38, %v1709_v45 }
 0x144   :  { %v954_v5 = vadd.f32 6.2831855, %v922_v37  ;;  %v928_v15 = vmul.f32 %v896_v12, %v1671_v11  ;;  %v959_v48 = vadd.f32 6.2831855, %v927_v33  ;;  %v740_v61 = vmul.f32 %v708_v59, %v1715_v42 }
 0x145   :  { %v829_v18 = vadd.f32 81.60525, %v797_v62  ;;  %v985_v26 = vmul.f32 %v953_v44, %v1639_v7  ;;  %v830_v39 = vadd.f32 81.60525, %v798_v6  ;;  %v771_v35 = vadd.f32 -76.70577, %v739_v58 }
 0x146   :  { %v986_v60 = vmul.f32 %v954_v5, %v1642_v21  ;;  %v960_v34 = vadd.f32 6.2831855, %v928_v15  ;;  %v991_v46 = vmul.f32 %v959_v48, %v1647_v25  ;;  %v772_v47 = vadd.f32 -76.70577, %v740_v61 }
 0x147   :  { %v861_v40 = vmul.f32 %v829_v18, %v1689_v20  ;;  %1017 = vst [vmem:[#allocation4 + $0x70] sm:$0xff] %v985_v26  ;;  %v862_v11 = vmul.f32 %v830_v39, %v1695_v28  ;;  %v803_v3 = vmul.f32 %v771_v35, %v1709_v45  ;;  %v385_v36 = vadd.f32 %v345_v27, %v1299_v13  ;;  %v361_v26 = vpop.permute.xlu1 %360 }
 0x148   :  { %1018 = vst [vmem:[#allocation4 + $0x78] sm:$0xff] %v986_v60  ;;  %v386_v7 = vadd.f32 %v345_v27, %v1302_v14  ;;  %v992_v21 = vmul.f32 %v960_v34, %v1657_v22  ;;  %1023 = vst [vmem:[#allocation4 + $0xa0] sm:$0xff] %v991_v46  ;;  %v804_v2 = vmul.f32 %v772_v47, %v1715_v42 }
 0x149   :  { %v893_v1 = vadd.f32 -41.3417, %v861_v40  ;;  %v391_v25 = vadd.f32 %v357_v43, %v1355_v51  ;;  %v894_v24 = vadd.f32 -41.3417, %v862_v11  ;;  %v835_v4 = vadd.f32 81.60525, %v803_v3 }
 0x14a   :  { %v417_v63 = vadd.f32 0.5, %v385_v36  ;;  %v418_v57 = vadd.f32 0.5, %v386_v7  ;;  %1024 = vst [vmem:[#allocation4 + $0xa8] sm:$0xff] %v992_v21  ;;  %v836_v31 = vadd.f32 81.60525, %v804_v2  ;;  %v392_v13 = vadd.f32 %v357_v43, %v1358_v52 }
 0x14b   :  { %v925_v41 = vmul.f32 %v893_v1, %v1689_v20  ;;  %v423_v10 = vadd.f32 0.5, %v391_v25  ;;  %v926_v14 = vmul.f32 %v894_v24, %v1695_v28  ;;  %v867_v22 = vmul.f32 %v835_v4, %v1709_v45 }
 0x14c   :  { %v449_v55 = vfloor.f32 %v417_v63  ;;  %v450_v56 = vfloor.f32 %v418_v57  ;;  %v868_v51 = vmul.f32 %v836_v31, %v1715_v42  ;;  %v424_v50 = vadd.f32 0.5, %v392_v13 }
 0x14d   :  { %v957_v16 = vadd.f32 6.2831855, %v925_v41  ;;  %v455_v9 = vfloor.f32 %v423_v10  ;;  %v958_v23 = vadd.f32 6.2831855, %v926_v14  ;;  %v899_v37 = vadd.f32 -41.3417, %v867_v22 }
 0x14e   :  { %v1761_v32 = vsub.f32 %v385_v36, %v449_v55  ;;  %v1763_v20 = vsub.f32 %v386_v7, %v450_v56  ;;  %v900_v38 = vadd.f32 -41.3417, %v868_v51  ;;  %v456_v28 = vfloor.f32 %v424_v50 }
 0x14f   :  { %v989_v52 = vmul.f32 %v957_v16, %v1681_v17  ;;  %v1766_v12 = vsub.f32 %v391_v25, %v455_v9  ;;  %v990_v33 = vmul.f32 %v958_v23, %v1684_v0  ;;  %v931_v62 = vmul.f32 %v899_v37, %v1709_v45 }
 0x150   :  { %v1772_v59 = vmul.f32 %v1761_v32, %v1761_v32  ;;  %v1776_v44 = vmul.f32 %v1763_v20, %v1763_v20  ;;  %v932_v5 = vmul.f32 %v900_v38, %v1715_v42  ;;  %v1779_v17 = vsub.f32 %v392_v13, %v456_v28 }
 0x151   :  { %1021 = vst [vmem:[#allocation4 + $0x90] sm:$0xff] %v989_v52  ;;  %v1783_v6 = vmul.f32 %v1766_v12, %v1766_v12  ;;  %v389_v0 = vadd.f32 %v353_v53, %v1331_v29  ;;  %1022 = vst [vmem:[#allocation4 + $0x98] sm:$0xff] %v990_v33  ;;  %v963_v45 = vadd.f32 6.2831855, %v931_v62  ;;  %v390_v48 = vadd.f32 %v353_v53, %v1334_v30 }
 0x152   :  { %v545_v58 = vmul.f32 -0.6160274, %v1772_v59  ;;  %v546_v15 = vmul.f32 -0.6160274, %v1776_v44  ;;  %v964_v18 = vadd.f32 6.2831855, %v932_v5  ;;  %v1791_v42 = vmul.f32 %v1779_v17, %v1779_v17 }
 0x153   :  { %v551_v61 = vmul.f32 -0.6160274, %v1783_v6  ;;  %v421_v27 = vadd.f32 0.5, %v389_v0  ;;  %v995_v60 = vmul.f32 %v963_v45, %v1700_v54  ;;  %v422_v35 = vadd.f32 0.5, %v390_v48 }
 0x154   :  { %v577_v29 = vadd.f32 3.7768927, %v545_v58  ;;  %v578_v39 = vadd.f32 3.7768927, %v546_v15  ;;  %v996_v43 = vmul.f32 %v964_v18, %v1703_v19  ;;  %v552_v34 = vmul.f32 -0.6160274, %v1791_v42 }
 0x155   :  { %v583_v46 = vadd.f32 3.7768927, %v551_v61  ;;  %v453_v30 = vfloor.f32 %v421_v27  ;;  %1027 = vst [vmem:[#allocation4 + $0xc0] sm:$0xff] %v995_v60  ;;  %v454_v11 = vfloor.f32 %v422_v35  ;;  %v393_v3 = vadd.f32 %v361_v26, %v1361_v49 }
 0x156   :  { %v609_v40 = vmul.f32 %v577_v29, %v1772_v59  ;;  %v610_v47 = vmul.f32 %v578_v39, %v1776_v44  ;;  %1028 = vst [vmem:[#allocation4 + $0xc8] sm:$0xff] %v996_v43  ;;  %v584_v36 = vadd.f32 3.7768927, %v552_v34  ;;  %v394_v19 = vadd.f32 %v361_v26, %v1364_v8 }
 0x157   :  { %v615_v54 = vmul.f32 %v583_v46, %v1783_v6  ;;  %v1801_v7 = vsub.f32 %v389_v0, %v453_v30  ;;  %v1804_v2 = vsub.f32 %v390_v48, %v454_v11  ;;  %v425_v25 = vadd.f32 0.5, %v393_v3 }
 0x158   :  { %v641_v21 = vadd.f32 -15.084919, %v609_v40  ;;  %v642_v1 = vadd.f32 -15.084919, %v610_v47  ;;  %v616_v24 = vmul.f32 %v584_v36, %v1791_v42  ;;  %v426_v49 = vadd.f32 0.5, %v394_v19 }
 0x159   :  { %v647_v4 = vadd.f32 -15.084919, %v615_v54  ;;  %v1809_v63 = vmul.f32 %v1801_v7, %v1801_v7  ;;  %v1815_v8 = vmul.f32 %v1804_v2, %v1804_v2  ;;  %v457_v31 = vfloor.f32 %v425_v25 }
 0x15a   :  { %v673_v57 = vmul.f32 %v641_v21, %v1772_v59  ;;  %v674_v41 = vmul.f32 %v642_v1, %v1776_v44  ;;  %v648_v13 = vadd.f32 -15.084919, %v616_v24  ;;  %v458_v22 = vfloor.f32 %v426_v49 }
 0x15b   :  { %v679_v10 = vmul.f32 %v647_v4, %v1783_v6  ;;  %v549_v14 = vmul.f32 -0.6160274, %v1809_v63  ;;  %v550_v16 = vmul.f32 -0.6160274, %v1815_v8  ;;  %v1820_v51 = vsub.f32 %v393_v3, %v457_v31 }
 0x15c   :  { %v705_v55 = vadd.f32 42.05744, %v673_v57  ;;  %v706_v56 = vadd.f32 42.05744, %v674_v41  ;;  %v680_v50 = vmul.f32 %v648_v13, %v1791_v42  ;;  %v1823_v23 = vsub.f32 %v394_v19, %v458_v22 }
 0x15d   :  { %v711_v9 = vadd.f32 42.05744, %v679_v10  ;;  %v581_v53 = vadd.f32 3.7768927, %v549_v14  ;;  %v582_v38 = vadd.f32 3.7768927, %v550_v16  ;;  %v1829_v28 = vmul.f32 %v1820_v51, %v1820_v51 }
 0x15e   :  { %v737_v37 = vmul.f32 %v705_v55, %v1772_v59  ;;  %v738_v52 = vmul.f32 %v706_v56, %v1776_v44  ;;  %v712_v33 = vadd.f32 42.05744, %v680_v50  ;;  %v1835_v0 = vmul.f32 %v1823_v23, %v1823_v23 }
 0x15f   :  { %v743_v62 = vmul.f32 %v711_v9, %v1783_v6  ;;  %v613_v5 = vmul.f32 %v581_v53, %v1809_v63  ;;  %v614_v15 = vmul.f32 %v582_v38, %v1815_v8  ;;  %v553_v48 = vmul.f32 -0.6160274, %v1829_v28 }
 0x160   :  { %v769_v45 = vadd.f32 -76.70577, %v737_v37  ;;  %v770_v58 = vadd.f32 -76.70577, %v738_v52  ;;  %v744_v18 = vmul.f32 %v712_v33, %v1791_v42  ;;  %v554_v26 = vmul.f32 -0.6160274, %v1835_v0 }
 0x161   :  { %v775_v61 = vadd.f32 -76.70577, %v743_v62  ;;  %v645_v27 = vadd.f32 -15.084919, %v613_v5  ;;  %v646_v39 = vadd.f32 -15.084919, %v614_v15 }
 0x162   :  { %v801_v60 = vmul.f32 %v769_v45, %v1772_v59  ;;  %v802_v29 = vmul.f32 %v770_v58, %v1776_v44  ;;  %v585_v35 = vadd.f32 3.7768927, %v553_v48  ;;  %v776_v43 = vadd.f32 -76.70577, %v744_v18 }
 0x163   :  { %v807_v34 = vmul.f32 %v775_v61, %v1783_v6  ;;  %v677_v46 = vmul.f32 %v645_v27, %v1809_v63  ;;  %v586_v30 = vadd.f32 3.7768927, %v554_v26  ;;  %v678_v11 = vmul.f32 %v646_v39, %v1815_v8 }
 0x164   :  { %v833_v40 = vadd.f32 81.60525, %v801_v60  ;;  %v834_v47 = vadd.f32 81.60525, %v802_v29  ;;  %v617_v3 = vmul.f32 %v585_v35, %v1829_v28  ;;  %v808_v36 = vmul.f32 %v776_v43, %v1791_v42 }
 0x165   :  { %v839_v54 = vadd.f32 81.60525, %v807_v34  ;;  %v709_v19 = vadd.f32 42.05744, %v677_v46  ;;  %v618_v21 = vmul.f32 %v586_v30, %v1835_v0  ;;  %v710_v24 = vadd.f32 42.05744, %v678_v11 }
 0x166   :  { %v865_v1 = vmul.f32 %v833_v40, %v1772_v59  ;;  %v866_v25 = vmul.f32 %v834_v47, %v1776_v44  ;;  %v649_v4 = vadd.f32 -15.084919, %v617_v3  ;;  %v840_v49 = vadd.f32 81.60525, %v808_v36 }
 0x167   :  { %v871_v57 = vmul.f32 %v839_v54, %v1783_v6  ;;  %v741_v41 = vmul.f32 %v709_v19, %v1809_v63  ;;  %v650_v31 = vadd.f32 -15.084919, %v618_v21  ;;  %v742_v14 = vmul.f32 %v710_v24, %v1815_v8 }
 0x168   :  { %v897_v13 = vadd.f32 -41.3417, %v865_v1  ;;  %v898_v10 = vadd.f32 -41.3417, %v866_v25  ;;  %v681_v22 = vmul.f32 %v649_v4, %v1829_v28  ;;  %v872_v55 = vmul.f32 %v840_v49, %v1791_v42 }
 0x169   :  { %v903_v56 = vadd.f32 -41.3417, %v871_v57  ;;  %v773_v16 = vadd.f32 -76.70577, %v741_v41  ;;  %v682_v50 = vmul.f32 %v650_v31, %v1835_v0  ;;  %v774_v37 = vadd.f32 -76.70577, %v742_v14 }
 0x16a   :  { %v929_v9 = vmul.f32 %v897_v13, %v1772_v59  ;;  %v930_v53 = vmul.f32 %v898_v10, %v1776_v44  ;;  %v713_v52 = vadd.f32 42.05744, %v681_v22  ;;  %v904_v38 = vadd.f32 -41.3417, %v872_v55 }
 0x16b   :  { %v935_v33 = vmul.f32 %v903_v56, %v1783_v6  ;;  %v805_v62 = vmul.f32 %v773_v16, %v1809_v63  ;;  %v714_v5 = vadd.f32 42.05744, %v682_v50  ;;  %v806_v15 = vmul.f32 %v774_v37, %v1815_v8 }
 0x16c   :  { %v961_v45 = vadd.f32 6.2831855, %v929_v9  ;;  %v962_v58 = vadd.f32 6.2831855, %v930_v53  ;;  %v745_v48 = vmul.f32 %v713_v52, %v1829_v28  ;;  %v936_v18 = vmul.f32 %v904_v38, %v1791_v42 }
 0x16d   :  { %v967_v61 = vadd.f32 6.2831855, %v935_v33  ;;  %v837_v59 = vadd.f32 81.60525, %v805_v62  ;;  %v746_v44 = vmul.f32 %v714_v5, %v1835_v0  ;;  %v838_v6 = vadd.f32 81.60525, %v806_v15 }
 0x16e   :  { %v993_v27 = vmul.f32 %v961_v45, %v1761_v32  ;;  %v994_v26 = vmul.f32 %v962_v58, %v1763_v20  ;;  %v777_v60 = vadd.f32 -76.70577, %v745_v48  ;;  %v968_v29 = vadd.f32 6.2831855, %v936_v18 }
 0x16f   :  { %v999_v39 = vmul.f32 %v967_v61, %v1766_v12  ;;  %v869_v35 = vmul.f32 %v837_v59, %v1809_v63  ;;  %v778_v43 = vadd.f32 -76.70577, %v746_v44  ;;  %v870_v42 = vmul.f32 %v838_v6, %v1815_v8 }
 0x170   :  { %1025 = vst [vmem:[#allocation4 + $0xb0] sm:$0xff] %v993_v27  ;;  %1026 = vst [vmem:[#allocation4 + $0xb8] sm:$0xff] %v994_v26  ;;  %v809_v34 = vmul.f32 %v777_v60, %v1829_v28  ;;  %v1000_v46 = vmul.f32 %v968_v29, %v1779_v17 }
 0x171   :  { %1031 = vst [vmem:[#allocation4 + $0xe0] sm:$0xff] %v999_v39  ;;  %v901_v32 = vadd.f32 -41.3417, %v869_v35  ;;  %v810_v20 = vmul.f32 %v778_v43, %v1835_v0  ;;  %v902_v30 = vadd.f32 -41.3417, %v870_v42 }
 0x172   :  { %v841_v40 = vadd.f32 81.60525, %v809_v34  ;;  %1032 = vst [vmem:[#allocation4 + $0xe8] sm:$0xff] %v1000_v46 }
 0x173   :  { %v933_v12 = vmul.f32 %v901_v32, %v1809_v63  ;;  %v842_v47 = vadd.f32 81.60525, %v810_v20  ;;  %v934_v11 = vmul.f32 %v902_v30, %v1815_v8 }
 0x174   :  { %v873_v3 = vmul.f32 %v841_v40, %v1829_v28 }
 0x175   :  { %v965_v36 = vadd.f32 6.2831855, %v933_v12  ;;  %v874_v54 = vmul.f32 %v842_v47, %v1835_v0  ;;  %v966_v19 = vadd.f32 6.2831855, %v934_v11 }
 0x176   :  { %v905_v21 = vadd.f32 -41.3417, %v873_v3 }
 0x177   :  { %v997_v17 = vmul.f32 %v965_v36, %v1801_v7  ;;  %v906_v1 = vadd.f32 -41.3417, %v874_v54  ;;  %v998_v25 = vmul.f32 %v966_v19, %v1804_v2 }
 0x178   :  { %v937_v24 = vmul.f32 %v905_v21, %v1829_v28 }
 0x179   :  { %1029 = vst [vmem:[#allocation4 + $0xd0] sm:$0xff] %v997_v17  ;;  %v938_v63 = vmul.f32 %v906_v1, %v1835_v0  ;;  %1030 = vst [vmem:[#allocation4 + $0xd8] sm:$0xff] %v998_v25 }
 0x17a   :  { %v969_v8 = vadd.f32 6.2831855, %v937_v24 }
 0x17b   :  { %v970_v4 = vadd.f32 6.2831855, %v938_v63 }
 0x17c   :  { %v1001_v49 = vmul.f32 %v969_v8, %v1820_v51 }
 0x17d   :  { %v1002_v57 = vmul.f32 %v970_v4, %v1823_v23 }
 0x17e   :  { %1033 = vst [vmem:[#allocation4 + $0xf0] sm:$0xff] %v1001_v49 }
 0x17f   :  { %1034 = vst [vmem:[#allocation4 + $0xf8] sm:$0xff] %v1002_v57 }
 0x180   :  { %1088 = shalt.err (!%p1085_p9)
}
 0x181   :  { %s1089_s24 = scalar_lea.hbm %s1897_s2, 4096 }
 0x182   :  { %p1090_p10 = scmp.ne.s32.totalorder %s1897_s2, %s1089_s24  ;;  %p1093_p11 = scmp.lt.u32.totalorder %s1089_s24, %s1897_s2 }
 0x184   :  { %p1095_p12 = pnand %p1093_p11, %p1090_p10 }
 0x186   :  { %1098 = shalt.err (!%p1095_p12)
}
 0x187   :  { %s1108_s29 = smov 256   ;;  %s1109_s30 = smov 16  }
 0x188   :  { %1046 = dma.vmem_to_hbm [thread:$0]  %s1041_s20, 4096, %s1897_s2, [#allocation5], %s1108_s29, %s1108_s29, %s1109_s30  }
 0x189   :  { %1101 = dma.done.wait [#allocation5], 4096  }
 0x18a   :  { %1102 = vsyncadd [#allocation5], 4294963200 }
 0x18b   :  { %1050 = vsyncpa [#allocation5], 1 }

</bundles_post_ra>
